<compile_context>
chip_gen: v7x
topology: tpu7x:2x2x1
jax: 0.10.0
libtpu: 0.0.40
codegen_flags: <defaults>
</compile_context>

<pallas_src>
import jax
import jax.numpy as jnp
from jax import lax
from jax.experimental import pallas as pl
from jax.experimental.pallas import tpu as pltpu


def _make_conv3x3_kernel(Cin, Cout, H, W):
    """Per-batch-element kernel: fused 3x3 same conv on a lane-dense image."""
    L = H * W
    offsets = [(kh - 1, kw - 1) for kh in range(3) for kw in range(3)]

    def kernel(x_ref, w_ref, m_ref, b_ref, o_ref):
        # x_ref: (1, Cin, L)    lane-dense flattened input image
        # w_ref: (9, Cout, Cin) tap-major weights, tap t = kh*3 + kw
        # m_ref: (9, 1, L)      0/1 boundary masks per tap (resident)
        # b_ref: (Cout, 1)      bias
        # o_ref: (1, Cout, L)   lane-dense conv output (phase-grouped channels)
        x = x_ref[0]                                           # (Cin, L)

        acc = jnp.zeros((Cout, L), jnp.float32)
        for t, (dh, dw) in enumerate(offsets):
            off = dh * W + dw
            if off == 0:
                tap = x                                        # center tap: no shift/mask
            else:
                # tap[:, p] = x[:, p + off] (wrap-around values are zeroed by
                # the mask); roll lands on the XLU slot, the mask on the VPU.
                tap = pltpu.roll(x, shift=(-off) % L, axis=1)
                tap = tap * m_ref[t]                           # (1, L) bcast over Cin
            acc = acc + jnp.dot(w_ref[t], tap,
                                preferred_element_type=jnp.float32)

        o_ref[0] = (acc + b_ref[...]).astype(o_ref.dtype)

    return kernel


def subpixel_conv2d(x_nchw, weight, bias, upscale_ratio):
    """Forward pass of SubpixelConv2d.

    x_nchw : (N, Cin, H, W)      float32
    weight : (Cout, Cin, 3, 3)   float32, Cout = 3 * r**2
    bias   : (Cout,)             float32
    returns: (N, 3, H*r, W*r)    float32 (NCHW, like PyTorch)
    """
    r = upscale_ratio
    N, Cin, H, W = x_nchw.shape
    Cout = weight.shape[0]
    assert Cout == 3 * r * r
    L = H * W

    # ---- glue (all cheap): lane-dense views, no spatial padding ----
    x_flat = x_nchw.reshape(N, Cin, L)                     # free contiguous merge
    # (Cout, Cin, 3, 3) -> (3, 3, Cout, Cin) -> (9, Cout, Cin); tap t = kh*3+kw
    w_taps = jnp.transpose(weight, (2, 3, 0, 1)).reshape(9, Cout, Cin)
    b = bias.reshape(Cout, 1)

    # Precomputed 0/1 boundary masks (replace zero-padding): mask[t, 0, h*W+w]
    # is 1 iff input pixel (h+dh, w+dw) is in-bounds for tap t = (dh, dw).
    hh = jnp.arange(H).reshape(H, 1)
    ww = jnp.arange(W).reshape(1, W)
    mask_rows = []
    for kh in range(3):
        for kw in range(3):
            dh, dw = kh - 1, kw - 1
            ok = ((hh + dh >= 0) & (hh + dh <= H - 1) &
                  (ww + dw >= 0) & (ww + dw <= W - 1))
            mask_rows.append(ok.astype(jnp.float32).reshape(1, L))
    tap_mask = jnp.stack(mask_rows, axis=0)                # (9, 1, L), ~9 KiB

    kernel = _make_conv3x3_kernel(Cin, Cout, H, W)

    # ---- hot path: fused 3x3 conv, one whole image per grid step ----
    z = pl.pallas_call(
        kernel,
        out_shape=jax.ShapeDtypeStruct((N, Cout, L), jnp.float32),
        grid_spec=pltpu.PrefetchScalarGridSpec(
            num_scalar_prefetch=0,
            grid=(N,),
            in_specs=[
                pl.BlockSpec((1, Cin, L), lambda n: (n, 0, 0)),
                pl.BlockSpec((9, Cout, Cin), lambda n: (0, 0, 0)),   # resident
                pl.BlockSpec((9, 1, L), lambda n: (0, 0, 0)),        # resident
                pl.BlockSpec((Cout, 1), lambda n: (0, 0)),           # resident
            ],
            out_specs=pl.BlockSpec((1, Cout, L), lambda n: (n, 0, 0)),
        ),
        compiler_params=pltpu.CompilerParams(
            dimension_semantics=("parallel",),
        ),
    )(x_flat, w_taps, tap_mask, b)                          # (N, Cout, L)

    # ---- glue: PixelShuffle(r) from the phase-grouped kernel layout ----
    # out[n, c, h*r+i, w*r+j] = z[n, (c*r+i)*r+j, h*W+w]  (single fusable transpose)
    z = z.reshape(N, 3, r, r, H, W)
    z = jnp.transpose(z, (0, 1, 4, 2, 5, 3))                # (N, 3, H, r, W, r)
    return z.reshape(N, 3, H * r, W * r)


def _reference(x_nchw, weight, bias, r):
    """Pure-JAX reference (lax conv + pixel shuffle) for a correctness check."""
    z = lax.conv_general_dilated(
        x_nchw, weight, window_strides=(1, 1), padding=((1, 1), (1, 1)),
        dimension_numbers=("NCHW", "OIHW", "NCHW"))
    z = z + bias.reshape(1, -1, 1, 1)
    N, C, H, W = z.shape
    z = z.reshape(N, 3, r, r, H, W)
    z = jnp.transpose(z, (0, 1, 4, 2, 5, 3))
    return z.reshape(N, 3, H * r, W * r)


if __name__ == "__main__":
    # SubpixelConv2d(in_channels=4, upscale_ratio=2)
    in_channels = 4
    upscale_ratio = 2
    out_channels = 3 * upscale_ratio ** 2

    key = jax.random.PRNGKey(0)
    kx, kw, kb = jax.random.split(key, 3)

    x = jax.random.normal(kx, (2, in_channels, 16, 16), dtype=jnp.float32)
    weight = jax.random.normal(
        kw, (out_channels, in_channels, 3, 3), dtype=jnp.float32) * 0.1
    bias = jax.random.normal(kb, (out_channels,), dtype=jnp.float32) * 0.1

    out = jax.block_until_ready(subpixel_conv2d(x, weight, bias, upscale_ratio))
    ref = jax.block_until_ready(_reference(x, weight, bias, upscale_ratio))

    assert out.shape == (2, 3, 16 * upscale_ratio, 16 * upscale_ratio)
    assert jnp.allclose(out, ref, atol=1e-4, rtol=1e-4), "mismatch vs reference"

    print("KERNEL_OK")
</pallas_src>

<mosaic_0001>
module attributes {stable_mosaic.version = 11 : i64} {
  func.func @kernel(%arg0: i32, %arg1: memref<1x4x256xf32, #tpu.memory_space<vmem>>, %arg2: memref<9x12x4xf32, #tpu.memory_space<vmem>>, %arg3: memref<9x1x256xf32, #tpu.memory_space<vmem>>, %arg4: memref<12x1xf32, #tpu.memory_space<vmem>>, %arg5: memref<1x12x256xf32, #tpu.memory_space<vmem>>) attributes {dimension_semantics = [#tpu.dimension_semantics<parallel>], iteration_bounds = array<i64: 2>, scalar_prefetch = 0 : i64, scratch_operands = 0 : i64, tpu.core_type = #tpu.core_type<tc>, window_params = [{transform_indices = @transform_0, window_bounds = array<i64: 1, 4, 256>}, {pipeline_mode = #tpu.pipeline_mode<synchronous>, transform_indices = @transform_1, window_bounds = array<i64: 9, 12, 4>}, {pipeline_mode = #tpu.pipeline_mode<synchronous>, transform_indices = @transform_2, window_bounds = array<i64: 9, 1, 256>}, {pipeline_mode = #tpu.pipeline_mode<synchronous>, transform_indices = @transform_3, window_bounds = array<i64: 12, 1>}, {transform_indices = @transform_4, window_bounds = array<i64: 1, 12, 256>}]} {
    %c0 = arith.constant 0 : index
    %c0_0 = arith.constant 0 : index
    %c0_1 = arith.constant 0 : index
    %0 = vector.load %arg1[%c0, %c0_0, %c0_1] : memref<1x4x256xf32, #tpu.memory_space<vmem>>, vector<1x4x256xf32>
    %1 = vector.shape_cast %0 : vector<1x4x256xf32> to vector<4x256xf32>
    %cst = arith.constant 0.000000e+00 : f32
    %2 = vector.broadcast %cst : f32 to vector<12x256xf32>
    %c17_i32 = arith.constant 17 : i32
    %3 = tpu.dynamic_rotate %1 by %c17_i32 dim 1 : vector<4x256xf32>, i32 -> vector<4x256xf32>
    %c0_2 = arith.constant 0 : index
    %c0_3 = arith.constant 0 : index
    %c0_4 = arith.constant 0 : index
    %4 = vector.load %arg3[%c0_2, %c0_3, %c0_4] : memref<9x1x256xf32, #tpu.memory_space<vmem>>, vector<1x1x256xf32>
    %5 = vector.shape_cast %4 : vector<1x1x256xf32> to vector<1x256xf32>
    %6 = vector.broadcast %5 : vector<1x256xf32> to vector<4x256xf32>
    %7 = arith.mulf %3, %6 : vector<4x256xf32>
    %c0_5 = arith.constant 0 : index
    %c0_6 = arith.constant 0 : index
    %c0_7 = arith.constant 0 : index
    %8 = vector.load %arg2[%c0_5, %c0_6, %c0_7] : memref<9x12x4xf32, #tpu.memory_space<vmem>>, vector<1x12x4xf32>
    %9 = vector.shape_cast %8 : vector<1x12x4xf32> to vector<12x4xf32>
    %cst_8 = arith.constant dense<0.000000e+00> : vector<12x256xf32>
    %10 = tpu.matmul %9, %7, %cst_8 {dimension_numbers = #tpu.dot_dimension_numbers<[1], [0], [0], [1], [0, 0, 1, 1], [], []>} : vector<12x4xf32>, vector<4x256xf32>, vector<12x256xf32> -> vector<12x256xf32>
    %11 = arith.addf %2, %10 : vector<12x256xf32>
    %c16_i32 = arith.constant 16 : i32
    %12 = tpu.dynamic_rotate %1 by %c16_i32 dim 1 : vector<4x256xf32>, i32 -> vector<4x256xf32>
    %c1 = arith.constant 1 : index
    %c0_9 = arith.constant 0 : index
    %c0_10 = arith.constant 0 : index
    %13 = vector.load %arg3[%c1, %c0_9, %c0_10] : memref<9x1x256xf32, #tpu.memory_space<vmem>>, vector<1x1x256xf32>
    %14 = vector.shape_cast %13 : vector<1x1x256xf32> to vector<1x256xf32>
    %15 = vector.broadcast %14 : vector<1x256xf32> to vector<4x256xf32>
    %16 = arith.mulf %12, %15 : vector<4x256xf32>
    %c1_11 = arith.constant 1 : index
    %c0_12 = arith.constant 0 : index
    %c0_13 = arith.constant 0 : index
    %17 = vector.load %arg2[%c1_11, %c0_12, %c0_13] : memref<9x12x4xf32, #tpu.memory_space<vmem>>, vector<1x12x4xf32>
    %18 = vector.shape_cast %17 : vector<1x12x4xf32> to vector<12x4xf32>
    %cst_14 = arith.constant dense<0.000000e+00> : vector<12x256xf32>
    %19 = tpu.matmul %18, %16, %cst_14 {dimension_numbers = #tpu.dot_dimension_numbers<[1], [0], [0], [1], [0, 0, 1, 1], [], []>} : vector<12x4xf32>, vector<4x256xf32>, vector<12x256xf32> -> vector<12x256xf32>
    %20 = arith.addf %11, %19 : vector<12x256xf32>
    %c15_i32 = arith.constant 15 : i32
    %21 = tpu.dynamic_rotate %1 by %c15_i32 dim 1 : vector<4x256xf32>, i32 -> vector<4x256xf32>
    %c2 = arith.constant 2 : index
    %c0_15 = arith.constant 0 : index
    %c0_16 = arith.constant 0 : index
    %22 = vector.load %arg3[%c2, %c0_15, %c0_16] : memref<9x1x256xf32, #tpu.memory_space<vmem>>, vector<1x1x256xf32>
    %23 = vector.shape_cast %22 : vector<1x1x256xf32> to vector<1x256xf32>
    %24 = vector.broadcast %23 : vector<1x256xf32> to vector<4x256xf32>
    %25 = arith.mulf %21, %24 : vector<4x256xf32>
    %c2_17 = arith.constant 2 : index
    %c0_18 = arith.constant 0 : index
    %c0_19 = arith.constant 0 : index
    %26 = vector.load %arg2[%c2_17, %c0_18, %c0_19] : memref<9x12x4xf32, #tpu.memory_space<vmem>>, vector<1x12x4xf32>
    %27 = vector.shape_cast %26 : vector<1x12x4xf32> to vector<12x4xf32>
    %cst_20 = arith.constant dense<0.000000e+00> : vector<12x256xf32>
    %28 = tpu.matmul %27, %25, %cst_20 {dimension_numbers = #tpu.dot_dimension_numbers<[1], [0], [0], [1], [0, 0, 1, 1], [], []>} : vector<12x4xf32>, vector<4x256xf32>, vector<12x256xf32> -> vector<12x256xf32>
    %29 = arith.addf %20, %28 : vector<12x256xf32>
    %c1_i32 = arith.constant 1 : i32
    %30 = tpu.dynamic_rotate %1 by %c1_i32 dim 1 : vector<4x256xf32>, i32 -> vector<4x256xf32>
    %c3 = arith.constant 3 : index
    %c0_21 = arith.constant 0 : index
    %c0_22 = arith.constant 0 : index
    %31 = vector.load %arg3[%c3, %c0_21, %c0_22] : memref<9x1x256xf32, #tpu.memory_space<vmem>>, vector<1x1x256xf32>
    %32 = vector.shape_cast %31 : vector<1x1x256xf32> to vector<1x256xf32>
    %33 = vector.broadcast %32 : vector<1x256xf32> to vector<4x256xf32>
    %34 = arith.mulf %30, %33 : vector<4x256xf32>
    %c3_23 = arith.constant 3 : index
    %c0_24 = arith.constant 0 : index
    %c0_25 = arith.constant 0 : index
    %35 = vector.load %arg2[%c3_23, %c0_24, %c0_25] : memref<9x12x4xf32, #tpu.memory_space<vmem>>, vector<1x12x4xf32>
    %36 = vector.shape_cast %35 : vector<1x12x4xf32> to vector<12x4xf32>
    %cst_26 = arith.constant dense<0.000000e+00> : vector<12x256xf32>
    %37 = tpu.matmul %36, %34, %cst_26 {dimension_numbers = #tpu.dot_dimension_numbers<[1], [0], [0], [1], [0, 0, 1, 1], [], []>} : vector<12x4xf32>, vector<4x256xf32>, vector<12x256xf32> -> vector<12x256xf32>
    %38 = arith.addf %29, %37 : vector<12x256xf32>
    %c4 = arith.constant 4 : index
    %c0_27 = arith.constant 0 : index
    %c0_28 = arith.constant 0 : index
    %39 = vector.load %arg2[%c4, %c0_27, %c0_28] : memref<9x12x4xf32, #tpu.memory_space<vmem>>, vector<1x12x4xf32>
    %40 = vector.shape_cast %39 : vector<1x12x4xf32> to vector<12x4xf32>
    %cst_29 = arith.constant dense<0.000000e+00> : vector<12x256xf32>
    %41 = tpu.matmul %40, %1, %cst_29 {dimension_numbers = #tpu.dot_dimension_numbers<[1], [0], [0], [1], [0, 0, 1, 1], [], []>} : vector<12x4xf32>, vector<4x256xf32>, vector<12x256xf32> -> vector<12x256xf32>
    %42 = arith.addf %38, %41 : vector<12x256xf32>
    %c255_i32 = arith.constant 255 : i32
    %43 = tpu.dynamic_rotate %1 by %c255_i32 dim 1 : vector<4x256xf32>, i32 -> vector<4x256xf32>
    %c5 = arith.constant 5 : index
    %c0_30 = arith.constant 0 : index
    %c0_31 = arith.constant 0 : index
    %44 = vector.load %arg3[%c5, %c0_30, %c0_31] : memref<9x1x256xf32, #tpu.memory_space<vmem>>, vector<1x1x256xf32>
    %45 = vector.shape_cast %44 : vector<1x1x256xf32> to vector<1x256xf32>
    %46 = vector.broadcast %45 : vector<1x256xf32> to vector<4x256xf32>
    %47 = arith.mulf %43, %46 : vector<4x256xf32>
    %c5_32 = arith.constant 5 : index
    %c0_33 = arith.constant 0 : index
    %c0_34 = arith.constant 0 : index
    %48 = vector.load %arg2[%c5_32, %c0_33, %c0_34] : memref<9x12x4xf32, #tpu.memory_space<vmem>>, vector<1x12x4xf32>
    %49 = vector.shape_cast %48 : vector<1x12x4xf32> to vector<12x4xf32>
    %cst_35 = arith.constant dense<0.000000e+00> : vector<12x256xf32>
    %50 = tpu.matmul %49, %47, %cst_35 {dimension_numbers = #tpu.dot_dimension_numbers<[1], [0], [0], [1], [0, 0, 1, 1], [], []>} : vector<12x4xf32>, vector<4x256xf32>, vector<12x256xf32> -> vector<12x256xf32>
    %51 = arith.addf %42, %50 : vector<12x256xf32>
    %c241_i32 = arith.constant 241 : i32
    %52 = tpu.dynamic_rotate %1 by %c241_i32 dim 1 : vector<4x256xf32>, i32 -> vector<4x256xf32>
    %c6 = arith.constant 6 : index
    %c0_36 = arith.constant 0 : index
    %c0_37 = arith.constant 0 : index
    %53 = vector.load %arg3[%c6, %c0_36, %c0_37] : memref<9x1x256xf32, #tpu.memory_space<vmem>>, vector<1x1x256xf32>
    %54 = vector.shape_cast %53 : vector<1x1x256xf32> to vector<1x256xf32>
    %55 = vector.broadcast %54 : vector<1x256xf32> to vector<4x256xf32>
    %56 = arith.mulf %52, %55 : vector<4x256xf32>
    %c6_38 = arith.constant 6 : index
    %c0_39 = arith.constant 0 : index
    %c0_40 = arith.constant 0 : index
    %57 = vector.load %arg2[%c6_38, %c0_39, %c0_40] : memref<9x12x4xf32, #tpu.memory_space<vmem>>, vector<1x12x4xf32>
    %58 = vector.shape_cast %57 : vector<1x12x4xf32> to vector<12x4xf32>
    %cst_41 = arith.constant dense<0.000000e+00> : vector<12x256xf32>
    %59 = tpu.matmul %58, %56, %cst_41 {dimension_numbers = #tpu.dot_dimension_numbers<[1], [0], [0], [1], [0, 0, 1, 1], [], []>} : vector<12x4xf32>, vector<4x256xf32>, vector<12x256xf32> -> vector<12x256xf32>
    %60 = arith.addf %51, %59 : vector<12x256xf32>
    %c240_i32 = arith.constant 240 : i32
    %61 = tpu.dynamic_rotate %1 by %c240_i32 dim 1 : vector<4x256xf32>, i32 -> vector<4x256xf32>
    %c7 = arith.constant 7 : index
    %c0_42 = arith.constant 0 : index
    %c0_43 = arith.constant 0 : index
    %62 = vector.load %arg3[%c7, %c0_42, %c0_43] : memref<9x1x256xf32, #tpu.memory_space<vmem>>, vector<1x1x256xf32>
    %63 = vector.shape_cast %62 : vector<1x1x256xf32> to vector<1x256xf32>
    %64 = vector.broadcast %63 : vector<1x256xf32> to vector<4x256xf32>
    %65 = arith.mulf %61, %64 : vector<4x256xf32>
    %c7_44 = arith.constant 7 : index
    %c0_45 = arith.constant 0 : index
    %c0_46 = arith.constant 0 : index
    %66 = vector.load %arg2[%c7_44, %c0_45, %c0_46] : memref<9x12x4xf32, #tpu.memory_space<vmem>>, vector<1x12x4xf32>
    %67 = vector.shape_cast %66 : vector<1x12x4xf32> to vector<12x4xf32>
    %cst_47 = arith.constant dense<0.000000e+00> : vector<12x256xf32>
    %68 = tpu.matmul %67, %65, %cst_47 {dimension_numbers = #tpu.dot_dimension_numbers<[1], [0], [0], [1], [0, 0, 1, 1], [], []>} : vector<12x4xf32>, vector<4x256xf32>, vector<12x256xf32> -> vector<12x256xf32>
    %69 = arith.addf %60, %68 : vector<12x256xf32>
    %c239_i32 = arith.constant 239 : i32
    %70 = tpu.dynamic_rotate %1 by %c239_i32 dim 1 : vector<4x256xf32>, i32 -> vector<4x256xf32>
    %c8 = arith.constant 8 : index
    %c0_48 = arith.constant 0 : index
    %c0_49 = arith.constant 0 : index
    %71 = vector.load %arg3[%c8, %c0_48, %c0_49] : memref<9x1x256xf32, #tpu.memory_space<vmem>>, vector<1x1x256xf32>
    %72 = vector.shape_cast %71 : vector<1x1x256xf32> to vector<1x256xf32>
    %73 = vector.broadcast %72 : vector<1x256xf32> to vector<4x256xf32>
    %74 = arith.mulf %70, %73 : vector<4x256xf32>
    %c8_50 = arith.constant 8 : index
    %c0_51 = arith.constant 0 : index
    %c0_52 = arith.constant 0 : index
    %75 = vector.load %arg2[%c8_50, %c0_51, %c0_52] : memref<9x12x4xf32, #tpu.memory_space<vmem>>, vector<1x12x4xf32>
    %76 = vector.shape_cast %75 : vector<1x12x4xf32> to vector<12x4xf32>
    %cst_53 = arith.constant dense<0.000000e+00> : vector<12x256xf32>
    %77 = tpu.matmul %76, %74, %cst_53 {dimension_numbers = #tpu.dot_dimension_numbers<[1], [0], [0], [1], [0, 0, 1, 1], [], []>} : vector<12x4xf32>, vector<4x256xf32>, vector<12x256xf32> -> vector<12x256xf32>
    %78 = arith.addf %69, %77 : vector<12x256xf32>
    %c0_54 = arith.constant 0 : index
    %c0_55 = arith.constant 0 : index
    %79 = vector.load %arg4[%c0_54, %c0_55] : memref<12x1xf32, #tpu.memory_space<vmem>>, vector<12x1xf32>
    %80 = vector.broadcast %79 : vector<12x1xf32> to vector<12x256xf32>
    %81 = arith.addf %78, %80 : vector<12x256xf32>
    %c0_56 = arith.constant 0 : index
    %c0_57 = arith.constant 0 : index
    %c0_58 = arith.constant 0 : index
    %82 = vector.load %arg5[%c0_56, %c0_57, %c0_58] : memref<1x12x256xf32, #tpu.memory_space<vmem>>, vector<1x12x256xf32>
    %83 = vector.shape_cast %82 : vector<1x12x256xf32> to vector<12x256xf32>
    %84 = vector.shape_cast %81 : vector<12x256xf32> to vector<1x12x256xf32>
    tpu.vector_store %arg5[%c0_56, %c0_57, %c0_58], %84 {strides = array<i32>} : memref<1x12x256xf32, #tpu.memory_space<vmem>>, vector<1x12x256xf32>,
    return
  }
  func.func @transform_0(%arg0: i32) -> (i32, i32, i32) {
    %c0_i32 = arith.constant 0 : i32
    %c0_i32_0 = arith.constant 0 : i32
    %c0_i32_1 = arith.constant 0 : i32
    return %arg0, %c0_i32, %c0_i32_0 : i32, i32, i32
  }
  func.func @transform_1(%arg0: i32) -> (i32, i32, i32) {
    %c0_i32 = arith.constant 0 : i32
    %c0_i32_0 = arith.constant 0 : i32
    %c0_i32_1 = arith.constant 0 : i32
    %c0_i32_2 = arith.constant 0 : i32
    return %c0_i32, %c0_i32_0, %c0_i32_1 : i32, i32, i32
  }
  func.func @transform_2(%arg0: i32) -> (i32, i32, i32) {
    %c0_i32 = arith.constant 0 : i32
    %c0_i32_0 = arith.constant 0 : i32
    %c0_i32_1 = arith.constant 0 : i32
    %c0_i32_2 = arith.constant 0 : i32
    return %c0_i32, %c0_i32_0, %c0_i32_1 : i32, i32, i32
  }
  func.func @transform_3(%arg0: i32) -> (i32, i32) {
    %c0_i32 = arith.constant 0 : i32
    %c0_i32_0 = arith.constant 0 : i32
    %c0_i32_1 = arith.constant 0 : i32
    return %c0_i32, %c0_i32_0 : i32, i32
  }
  func.func @transform_4(%arg0: i32) -> (i32, i32, i32) {
    %c0_i32 = arith.constant 0 : i32
    %c0_i32_0 = arith.constant 0 : i32
    %c0_i32_1 = arith.constant 0 : i32
    return %arg0, %c0_i32, %c0_i32_0 : i32, i32, i32
  }
}

</mosaic_0001>

<bundles_post_ra>
// kernel: tpu_custom_call.1
= control target key start
LH: loop header
LB: loop body
LE: loop exit
PB: predicated region body
PF: predicated region fallthrough
CT: control target
= control target key end

     0   :  { %s1479_s15 = smov 0   ;;  %s1700_s0 = inlined_call_operand.vmem [shape: f32[2,4,256], index: 0, kind: input, shape index: {}]   ;;  %s1701_s1 = inlined_call_operand.vmem [shape: f32[9,12,4], index: 1, kind: input, shape index: {}]   ;;  %s1702_s2 = inlined_call_operand.vmem [shape: f32[9,1,256], index: 2, kind: input, shape index: {}]   ;;  %s1703_s3 = inlined_call_operand.vmem [shape: f32[12,1], index: 3, kind: input, shape index: {}]   ;;  %s1704_s4 = inlined_call_operand.vmem [shape: f32[2,12,256], index: 4, kind: output, shape index: {}]  }
   0x1 LB: > { %s1309_s16 = sadd.s32 4294967295, %s1442_s15   ;;  %p1313_p0 = scmp.ge.s32.totalorder %s1442_s15, 1  ;;  %s1442_s15 = sphi %s1479_s15, %s14_s15  }
   0x2   : > { %p162_p1 = scmp.lt.s32.totalorder %s1442_s15, 3 }
   0x4   : > { %p163_p2 = pnand %p1313_p0, %p162_p1 }
   0x5   : > { %p188_p3 = scmp.lt.s32.totalorder (!%p163_p2), %s1309_s16, 1  ;;  %v1444_v0 = vmov (!%p163_p2), 0.0   ;;  %vm259_vm0 = vcmask (!%p163_p2), 1043456   ;;  %s1445_s21 = smov (!%p163_p2), 17   ;;  %vm252_vm1 = vcmask (!%p163_p2), 31744   ;;  %v1343_v3 = vld [vmem:[%s1701_s1 + $0x40] sm:$0xff] (!%p163_p2)  ;;  %v206_v7 = vlaneseq (!%p163_p2) }
   0x6   : > { %166 = sbr.rel (%p163_p2) target bundleno = 395 (0x18b), region = 36  ;;  %745 = vmatprep.mubr.f32.mxu0 (!%p163_p2), %v1444_v0  ;;  %330 = vmatprep.mubr.f32.mxu1 (!%p163_p2), %v1444_v0  ;;  %s1446_s22 = smov (!%p163_p2), 16   ;;  %v1234_v4 = vld [vmem:[%s1703_s3] sm:$0xff] (!%p163_p2)  ;;  %v1235_v5 = vld [vmem:[%s1703_s3 + $0x8] sm:$0xf] (!%p163_p2)  ;;  %v1453_v6 = vmov (!%p163_p2), 0  }
   0x7   : > { %s1447_s25 = smov (!%p163_p2), 127   ;;  %s1448_s26 = smov (!%p163_p2), 15   ;;  %1433 = vset.pattern.permute.xlu0 (!%p163_p2), %v1453_v6  ;;  %1434 = vset.pattern.permute.xlu1 (!%p163_p2), %v1453_v6  ;;  %v214_v8 = vshrl.u32 (!%p163_p2), %v206_v7, 7  ;;  %v1532_v9 = vand.u32 (!%p163_p2), 127, %v206_v7  ;;  %v1318_v12 = vld [vmem:[%s1702_s2 + $0x2] sm:$0x3] (!%p163_p2) }
   0x8   : > { %s1449_s27 = smov (!%p163_p2), 113   ;;  %s1450_s28 = smov (!%p163_p2), 1   ;;  %v211_v15 = vld [vmem:[%s1702_s2] sm:$0x3] (!%p163_p2)  ;;  %v1349_v18 = vld [vmem:[%s1702_s2 + $0xa] sm:$0x3] (!%p163_p2) }
   0x9   : > { %s1451_s29 = smov (!%p163_p2), 112   ;;  %s1452_s30 = smov (!%p163_p2), 111   ;;  %v1534_v10 = vsub.s32 (!%p163_p2), 0, %v214_v8  ;;  %v1536_v11 = vsub.s32 (!%p163_p2), 1, %v214_v8  ;;  %vm208_vm2 = vcmp.lt.s32.totalorder (!%p163_p2), %v1532_v9, 17  ;;  %vm231_vm3 = vcmp.lt.s32.totalorder (!%p163_p2), %v1532_v9, 16 }
   0xa   : > { %vm766_vm4 = vcmp.lt.s32.totalorder (!%p163_p2), %v1532_v9, 127  ;;  %v1319_v31 = vld [vmem:[%s1701_s1 + $0x10] sm:$0xff] (!%p163_p2)  ;;  %v1329_v32 = vld [vmem:[%s1702_s2 + $0x4] sm:$0x3] (!%p163_p2)  ;;  %vm436_vm5 = vcmp.lt.s32.totalorder (!%p163_p2), %v1532_v9, 15  ;;  %vm884_vm6 = vcmp.lt.s32.totalorder (!%p163_p2), %v1532_v9, 113 }
   0xb   : > { %v240_v16 = vrot.slane (!%p163_p2), %v1318_v12, %v1534_v10  ;;  %v244_v17 = vrot.slane (!%p163_p2), %v1318_v12, %v1536_v11  ;;  %v216_v19 = vrot.slane (!%p163_p2), %v211_v15, %v1534_v10  ;;  %v220_v20 = vrot.slane (!%p163_p2), %v211_v15, %v1536_v11  ;;  %v1320_v43 = vld [vmem:[%s1701_s1 + $0x18] sm:$0xf] (!%p163_p2)  ;;  %v1350_v44 = vld [vmem:[%s1701_s1 + $0x50] sm:$0xff] (!%p163_p2)  ;;  %v1356_v45 = vld [vmem:[%s1702_s2 + $0xc] sm:$0x3] (!%p163_p2) }
   0xc   : > { %v775_v26 = vrot.slane (!%p163_p2), %v1349_v18, %v1534_v10  ;;  %v779_v30 = vrot.slane (!%p163_p2), %v1349_v18, %v1536_v11  ;;  %v449_v41 = vrot.slane (!%p163_p2), %v1329_v32, %v1536_v11  ;;  %v445_v42 = vrot.slane (!%p163_p2), %v1329_v32, %v1534_v10  ;;  %v225_v54 = vld [vmem:[%s1701_s1] sm:$0xff] (!%p163_p2)  ;;  %v1351_v55 = vld [vmem:[%s1701_s1 + $0x58] sm:$0xf] (!%p163_p2)  ;;  %v1363_v6 = vld [vmem:[%s1702_s2 + $0xe] sm:$0x3] (!%p163_p2) }
   0xd   : > { %s1706_s16 = smov (!%p188_p3, %s1309_s16), 1  ;;  %v893_v51 = vrot.slane %v1356_v45, %v1534_v10  ;;  %v897_v52 = vrot.slane %v1356_v45, %v1536_v11  ;;  %v1336_v56 = vld [vmem:[%s1702_s2 + $0x6] sm:$0x3]  ;;  %vm554_vm7 = vcmp.lt.s32.totalorder %v1532_v9, 1  ;;  %vm1002_vm8 = vcmp.lt.s32.totalorder %v1532_v9, 112 }
   0xe   : > { %s1379_s17 = sshll.u32 %s1706_s16, 3  ;;  %v567_v63 = vrot.slane %v1336_v56, %v1536_v11  ;;  %v1011_v15 = vrot.slane %v1363_v6, %v1534_v10  ;;  %vm1120_vm9 = vcmp.lt.s32.totalorder %v1532_v9, 111  ;;  %s1380_s11 = sshll.u32 %s1706_s16, 5 }
   0xf   : > { %s192_s20 = scalar_lea.vmem %s1700_s0, %s1379_s17  ;;  %s197_s14 = scalar_lea.vmem %s1704_s4, %s1380_s11 }
  0x10   : > { %v1495_v1 = vld [vmem:[%s192_s20] sm:$0xff] }
  0x11   : > { %202 = vrot.lane.b32.xlu1 %v1495_v1, %s1445_s21  ;;  %227 = vrot.lane.b32.xlu0 %v1495_v1, %s1446_s22  ;;  %v1501_v2 = vcombine.high %v1495_v1, %v1495_v1 }
  0x13   : > { %1345 = vmatprep.subr.msk.mxu0 %vm259_vm0, %v1501_v2 }
  0x14   : > { %1346 = vmatpush1.msk.msra.mxu0 %vm259_vm0, %v1495_v1 }
  0x15   : > { %204 = vrot.lane.b32.xlu1 %v1501_v2, %s1445_s21  ;;  %229 = vrot.lane.b32.xlu0 %v1501_v2, %s1446_s22 }
  0x16   : > { %1347 = vmatmul.mubr.msk.f32.vlgmr.msra.gmra.mrb[0].mxu0 %vm252_vm1, %v1343_v3  ;;  %v563_v3 = vrot.slane %v1336_v56, %v1534_v10 }
  0x17   : > { %863 = vmatprep.mubr.f32.mxu0 %v1444_v0 }
  0x19   : > { %764 = vrot.lane.b32.xlu1 %v1501_v2, %s1447_s25  ;;  %762 = vrot.lane.b32.xlu0 %v1495_v1, %s1447_s25 }
  0x1d   : > { %434 = vrot.lane.b32.xlu1 %v1501_v2, %s1448_s26  ;;  %432 = vrot.lane.b32.xlu0 %v1495_v1, %s1448_s26 }
  0x21   : > { %882 = vrot.lane.b32.xlu1 %v1501_v2, %s1449_s27  ;;  %880 = vrot.lane.b32.xlu0 %v1495_v1, %s1449_s27 }
  0x25   : > { %552 = vrot.lane.b32.xlu1 %v1501_v2, %s1450_s28  ;;  %550 = vrot.lane.b32.xlu0 %v1495_v1, %s1450_s28 }
  0x29   : > { %1000 = vrot.lane.b32.xlu1 %v1501_v2, %s1451_s29  ;;  %998 = vrot.lane.b32.xlu0 %v1495_v1, %s1451_s29 }
  0x2d   : > { %1118 = vrot.lane.b32.xlu1 %v1501_v2, %s1452_s30  ;;  %1116 = vrot.lane.b32.xlu0 %v1495_v1, %s1452_s30 }
  0x31   : > { %1238 = vperm.xlu0 %1433, %v1234_v4   ;;  %1243 = vperm.xlu1 %1434, %v1235_v5   ;;  %v226_v4 = vld [vmem:[%s1701_s1 + $0x8] sm:$0xf]  ;;  %v1357_v5 = vld [vmem:[%s1701_s1 + $0x60] sm:$0xff] }
  0x83   : > { %v203_v13 = vpop.permute.xlu1 %202  ;;  %v228_v14 = vpop.permute.xlu0 %227 }
  0x87   : > { %v205_v21 = vpop.permute.xlu1 %204  ;;  %v230_v22 = vpop.permute.xlu0 %229 }
  0x88   : > { %v209_v23 = vsel %vm208_vm2, %v203_v13, %v205_v21  ;;  %v232_v24 = vsel %vm231_vm3, %v228_v14, %v230_v22  ;;  %v233_v25 = vsel %vm231_vm3, %v230_v22, %v228_v14  ;;  %v210_v27 = vsel %vm208_vm2, %v205_v21, %v203_v13 }
  0x89   : > { %v247_v28 = vmul.f32 %v240_v16, %v233_v25  ;;  %v248_v29 = vmul.f32 %v244_v17, %v232_v24  ;;  %v224_v33 = vmul.f32 %v220_v20, %v209_v23  ;;  %v223_v36 = vmul.f32 %v216_v19, %v210_v27  ;;  %v1370_v17 = vld [vmem:[%s1702_s2 + $0x10] sm:$0x3]  ;;  %v1330_v19 = vld [vmem:[%s1701_s1 + $0x20] sm:$0xff]  ;;  %v1358_v20 = vld [vmem:[%s1701_s1 + $0x68] sm:$0xf] }
  0x8a   : > { %v1015_v16 = vrot.slane %v1363_v6, %v1536_v11  ;;  %v1129_v25 = vrot.slane %v1370_v17, %v1534_v10  ;;  %v1364_v10 = vld [vmem:[%s1701_s1 + $0x70] sm:$0xff] }
  0x8b   : > { %v765_v34 = vpop.permute.xlu1 %764  ;;  %1321 = vmatprep.subr.msk.mxu1 %vm259_vm0, %v248_v29  ;;  %v763_v35 = vpop.permute.xlu0 %762  ;;  %v1331_v29 = vld [vmem:[%s1701_s1 + $0x28] sm:$0xf] }
  0x8c   : > { %v767_v37 = vsel %vm766_vm4, %v763_v35, %v765_v34  ;;  %v768_v38 = vsel %vm766_vm4, %v765_v34, %v763_v35  ;;  %1322 = vmatpush1.msk.msra.mxu1 %vm259_vm0, %v247_v28  ;;  %v1133_v28 = vrot.slane %v1370_v17, %v1536_v11  ;;  %v1337_v34 = vld [vmem:[%s1701_s1 + $0x30] sm:$0xff]  ;;  %v1365_v35 = vld [vmem:[%s1701_s1 + $0x78] sm:$0xf] }
  0x8d   : > { %v782_v39 = vmul.f32 %v775_v26, %v767_v37  ;;  %v783_v40 = vmul.f32 %v779_v30, %v768_v38  ;;  %1323 = vmatmul.mubr.msk.f32.vlgmr.msra.gmra.mrb[0].mxu1 %vm252_vm1, %v1319_v31  ;;  %1325 = vmatprep.subr.msk.mxu1 %vm259_vm0, %v224_v33  ;;  %v1344_v37 = vld [vmem:[%s1701_s1 + $0x48] sm:$0xf] }
  0x8e   : > { %1326 = vmatpush1.msk.msra.mxu1 %vm259_vm0, %v223_v36  ;;  %336 = vmatprep.mubr.f32.mxu1 %v1444_v0  ;;  %v1371_v36 = vld [vmem:[%s1701_s1 + $0x80] sm:$0xff] }
  0x8f   : > { %v435_v46 = vpop.permute.xlu1 %434  ;;  %v433_v47 = vpop.permute.xlu0 %432  ;;  %1352 = vmatprep.subr.msk.mxu0 %vm259_vm0, %v783_v40 }
  0x90   : > { %v437_v48 = vsel %vm436_vm5, %v433_v47, %v435_v46  ;;  %v438_v49 = vsel %vm436_vm5, %v435_v46, %v433_v47  ;;  %1353 = vmatpush1.msk.msra.mxu0 %vm259_vm0, %v782_v39 }
  0x91   : > { %v453_v50 = vmul.f32 %v449_v41, %v437_v48  ;;  %1324 = vmatmul.mubr.msk.f32.gmra.mrb[2].mxu1 %vm252_vm1, %v1320_v43  ;;  %1354 = vmatmul.mubr.msk.f32.vlgmr.msra.gmra.mrb[0].mxu0 %vm252_vm1, %v1350_v44  ;;  %v452_v53 = vmul.f32 %v445_v42, %v438_v49 }
  0x92   : > { %419 = vmatprep.mubr.f32.mxu1 %v1444_v0  ;;  %869 = vmatprep.mubr.f32.mxu0 %v1444_v0 }
  0x93   : > { %v883_v57 = vpop.permute.xlu1 %882  ;;  %1332 = vmatprep.subr.msk.mxu1 %vm259_vm0, %v453_v50  ;;  %v881_v58 = vpop.permute.xlu0 %880 }
  0x94   : > { %v885_v59 = vsel %vm884_vm6, %v881_v58, %v883_v57  ;;  %v886_v60 = vsel %vm884_vm6, %v883_v57, %v881_v58 }
  0x95   : > { %v900_v61 = vmul.f32 %v893_v51, %v885_v59  ;;  %v901_v62 = vmul.f32 %v897_v52, %v886_v60  ;;  %1327 = vmatmul.mubr.msk.f32.vlgmr.msra.gmra.mrb[0].mxu1 %vm252_vm1, %v225_v54  ;;  %1355 = vmatmul.mubr.msk.f32.gmra.mrb[2].mxu0 %vm252_vm1, %v1351_v55 }
  0x96   : > { %1333 = vmatpush1.msk.msra.mxu1 %vm259_vm0, %v452_v53  ;;  %425 = vmatprep.mubr.f32.mxu1 %v1444_v0 }
  0x97   : > { %v553_v7 = vpop.permute.xlu1 %552  ;;  %v551_v8 = vpop.permute.xlu0 %550  ;;  %1359 = vmatprep.subr.msk.mxu0 %vm259_vm0, %v901_v62  ;;  %981 = vmatprep.mubr.f32.mxu0 %v1444_v0 }
  0x98   : > { %v555_v12 = vsel %vm554_vm7, %v551_v8, %v553_v7  ;;  %v556_v13 = vsel %vm554_vm7, %v553_v7, %v551_v8  ;;  %1360 = vmatpush1.msk.msra.mxu0 %vm259_vm0, %v900_v61 }
  0x99   : > { %v571_v14 = vmul.f32 %v567_v63, %v555_v12  ;;  %1328 = vmatmul.mubr.msk.f32.gmra.mrb[2].mxu1 %vm252_vm1, %v226_v4  ;;  %1361 = vmatmul.mubr.msk.f32.vlgmr.msra.gmra.mrb[0].mxu0 %vm252_vm1, %v1357_v5  ;;  %v570_v18 = vmul.f32 %v563_v3, %v556_v13 }
  0x9a   : > { %533 = vmatprep.mubr.f32.mxu1 %v1444_v0  ;;  %987 = vmatprep.mubr.f32.mxu0 %v1444_v0 }
  0x9b   : > { %v1001_v21 = vpop.permute.xlu1 %1000  ;;  %1339 = vmatprep.subr.msk.mxu1 %vm259_vm0, %v571_v14  ;;  %v999_v22 = vpop.permute.xlu0 %998 }
  0x9c   : > { %v1003_v23 = vsel %vm1002_vm8, %v999_v22, %v1001_v21  ;;  %v1004_v24 = vsel %vm1002_vm8, %v1001_v21, %v999_v22 }
  0x9d   : > { %v1018_v26 = vmul.f32 %v1011_v15, %v1003_v23  ;;  %v1019_v27 = vmul.f32 %v1015_v16, %v1004_v24  ;;  %1334 = vmatmul.mubr.msk.f32.vlgmr.msra.gmra.mrb[0].mxu1 %vm252_vm1, %v1330_v19  ;;  %1362 = vmatmul.mubr.msk.f32.gmra.mrb[2].mxu0 %vm252_vm1, %v1358_v20 }
  0x9e   : > { %1340 = vmatpush1.msk.msra.mxu1 %vm259_vm0, %v570_v18  ;;  %539 = vmatprep.mubr.f32.mxu1 %v1444_v0 }
  0x9f   : > { %1366 = vmatprep.subr.msk.mxu0 %vm259_vm0, %v1019_v27  ;;  %1099 = vmatprep.mubr.f32.mxu0 %v1444_v0  ;;  %v1119_v30 = vpop.permute.xlu1 %1118  ;;  %v1117_v9 = vpop.permute.xlu0 %1116 }
  0xa0   : > { %1367 = vmatpush1.msk.msra.mxu0 %vm259_vm0, %v1018_v26  ;;  %v1121_v11 = vsel %vm1120_vm9, %v1117_v9, %v1119_v30  ;;  %v1122_v31 = vsel %vm1120_vm9, %v1119_v30, %v1117_v9  ;;  %1381 = vmatprep.subr.msk.mxu1 %vm259_vm0, %v1501_v2  ;;  %v1338_v2 = vld [vmem:[%s1701_s1 + $0x38] sm:$0xf] }
  0xa1   : > { %1335 = vmatmul.mubr.msk.f32.gmra.mrb[2].mxu1 %vm252_vm1, %v1331_v29  ;;  %1368 = vmatmul.mubr.msk.f32.vlgmr.msra.gmra.mrb[0].mxu0 %vm252_vm1, %v1364_v10  ;;  %v1136_v32 = vmul.f32 %v1129_v25, %v1121_v11  ;;  %v1137_v33 = vmul.f32 %v1133_v28, %v1122_v31 }
  0xa2   : > { %651 = vmatprep.mubr.f32.mxu1 %v1444_v0  ;;  %1105 = vmatprep.mubr.f32.mxu0 %v1444_v0 }
  0xa3   : > { %1373 = vmatprep.subr.msk.mxu0 %vm259_vm0, %v1137_v33 }
  0xa4   : > { %1374 = vmatpush1.msk.msra.mxu0 %vm259_vm0, %v1136_v32 }
  0xa5   : > { %1341 = vmatmul.mubr.msk.f32.vlgmr.msra.gmra.mrb[0].mxu1 %vm252_vm1, %v1337_v34  ;;  %1369 = vmatmul.mubr.msk.f32.gmra.mrb[2].mxu0 %vm252_vm1, %v1365_v35 }
  0xa6   : > { %657 = vmatprep.mubr.f32.mxu1 %v1444_v0  ;;  %1382 = vmatpush1.msk.msra.mxu1 %vm259_vm0, %v1495_v1  ;;  %v1372_v1 = vld [vmem:[%s1701_s1 + $0x88] sm:$0xf] }
  0xa7   : > { %1217 = vmatprep.mubr.f32.mxu0 %v1444_v0 }
  0xa9   : > { %1342 = vmatmul.mubr.msk.f32.gmra.mrb[2].mxu1 %vm252_vm1, %v1338_v2  ;;  %1375 = vmatmul.mubr.msk.f32.vlgmr.msra.gmra.mrb[0].mxu0 %vm252_vm1, %v1371_v36 }
  0xaa   : > { %1223 = vmatprep.mubr.f32.mxu0 %v1444_v0  ;;  %751 = vmatprep.mubr.f32.mxu1 %v1444_v0 }
  0xad   : > { %1376 = vmatmul.mubr.msk.f32.gmra.mrb[2].mxu0 %vm252_vm1, %v1372_v1 }
  0xb0   : > { %v1239_v41 = vpop.permute.xlu0 %1238  ;;  %v1244_v49 = vpop.permute.xlu1 %1243 }
  0xb1   : > { %1348 = vmatmul.mubr.msk.f32.vlgmr.msra.gmra.mrb[2].mxu1 %vm252_vm1, %v1344_v37 }
 0x178   : > { %v653_v38 = vpop.f32.mrb[0].mxu1 }
 0x179   : > { %v655_v39 = vpop.f32.mrb[1].mxu1 }
 0x17c   : > { %v1219_v40 = vpop.f32.mrb[0].mxu0 }
 0x17d   : > { %v1383_v42 = vadd.f32 %v1219_v40, %v653_v38  ;;  %v1221_v43 = vpop.f32.mrb[1].mxu0 }
 0x17e   : > { %v1384_v44 = vadd.f32 %v1221_v43, %v655_v39 }
 0x17f   : > { %v1246_v0 = vadd.f32 %v1383_v42, %v1239_v41 }
 0x180   : > { %v1247_v45 = vadd.f32 %v1384_v44, %v1239_v41  ;;  %v1225_v46 = vpop.f32.mrb[2].mxu0 }
 0x181   : > { %1250 = vst [vmem:[%s197_s14] sm:$0xff] %v1246_v0  ;;  %v1227_v47 = vpop.f32.mrb[3].mxu0 }
 0x182   : > { %1251 = vst [vmem:[%s197_s14 + $0x8] sm:$0xff] %v1247_v45 }
 0x184   : > { %v753_v48 = vpop.f32.mrb[2].mxu1 }
 0x185   : > { %v1385_v50 = vadd.f32 %v1225_v46, %v753_v48  ;;  %v755_v51 = vpop.f32.mrb[3].mxu1 }
 0x186   : > { %v1386_v52 = vadd.f32 %v1227_v47, %v755_v51 }
 0x187   : > { %v1248_v53 = vadd.f32 %v1385_v50, %v1244_v49 }
 0x188   : > { %v1249_v54 = vadd.f32 %v1386_v52, %v1244_v49 }
 0x189   : > { %1252 = vst [vmem:[%s197_s14 + $0x10] sm:$0xf] %v1248_v53 }
 0x18a   : > { %1253 = vst [vmem:[%s197_s14 + $0x18] sm:$0xf] %v1249_v54 }
 0x18b PF: > { %s14_s15 = sadd.s32 1, %s1442_s15  }
 0x18c   : > { %p11_p4 = scmp.ge.s32.totalorder %s14_s15, 4  }
 0x18e   :  { %13 = sbr.rel (!%p11_p4) target bundleno = 1 (0x1), region = 81 }

</bundles_post_ra>
